<compile_context>
chip_gen: v7x
topology: tpu7x:2x2x1
jax: 0.10.0
libtpu: 0.0.40
codegen_flags: <defaults>
</compile_context>

<pallas_src>
import jax
import jax.numpy as jnp
from jax.experimental import pallas as pl
from jax.experimental.pallas import tpu as pltpu

LANE = 128


def _round_up(n, m):
    return ((n + m - 1) // m) * m


def actor_critic_step_kernel(
    x_ref,        # (1, B, obs_dim)  current timestep observation
    h0_ref,       # (B, hidden)      initial hidden state (resident)
    w_in_ref,     # (obs_dim, hidden) folded encoder+input projection (resident)
    w_hh_ref,     # (hidden, hidden)  recurrent weights (resident)
    b_ref,        # (1, hidden)       folded bias b_enc@w_ih + b_ih + b_hh (resident)
    w_heads_ref,  # (hidden, 128)     [w_act | w_crit | I | 0] (resident)
    b_heads_ref,  # (1, 128)          [b_act | b_crit | 0 | 0] (resident)
    out_ref,      # (1, B, 128)       packed [logits | value | h_new | 0-pad]
    h_scratch,    # (B, hidden) VMEM  hidden state carried across grid steps
):
    t = pl.program_id(0)

    @pl.when(t == 0)
    def _():
        h_scratch[...] = h0_ref[...]

    x = x_ref[0]
    h = h_scratch[...]

    # Fused encoder + RNN input projection + recurrent projection.
    pre = (
        jnp.dot(x, w_in_ref[...], preferred_element_type=jnp.float32)
        + jnp.dot(h, w_hh_ref[...], preferred_element_type=jnp.float32)
        + b_ref[...]
    )
    h_new = jnp.tanh(pre)
    # TODO(synk): PyTorch code has a torch.isnan -> pdb debug hook; no runtime
    # equivalent in a TPU kernel, omitted.
    h_scratch[...] = h_new

    # One lane-dense head matmul: [actor logits | critic value | h_new passthrough].
    out_ref[0] = (
        jnp.dot(h_new, w_heads_ref[...], preferred_element_type=jnp.float32)
        + b_heads_ref[...]
    )


def fold_params(params):
    """Host-side parameter folding (exact f32)."""
    hp = jax.lax.Precision.HIGHEST
    w_enc, b_enc = params["w_enc"], params["b_enc"]
    w_ih, b_ih = params["w_ih"], params["b_ih"]
    w_hh, b_hh = params["w_hh"], params["b_hh"]
    w_act, b_act = params["w_act"], params["b_act"]
    w_crit, b_crit = params["w_crit"], params["b_crit"]

    hidden = w_hh.shape[1]
    act_dim = w_act.shape[1]
    lanes = _round_up(act_dim + 1 + hidden, LANE)

    # encoder folded into RNN input projection (no nonlinearity between them)
    w_in = jnp.dot(w_enc, w_ih, precision=hp)
    b_in = jnp.dot(b_enc, w_ih, precision=hp) + b_ih + b_hh

    # fused heads: [w_act | w_crit | identity (h passthrough) | zero pad]
    w_heads = jnp.zeros((hidden, lanes), jnp.float32)
    w_heads = w_heads.at[:, :act_dim].set(w_act)
    w_heads = w_heads.at[:, act_dim : act_dim + 1].set(w_crit)
    w_heads = w_heads.at[:, act_dim + 1 : act_dim + 1 + hidden].set(
        jnp.eye(hidden, dtype=jnp.float32)
    )
    b_heads = jnp.zeros((1, lanes), jnp.float32)
    b_heads = b_heads.at[:, :act_dim].set(b_act)
    b_heads = b_heads.at[:, act_dim : act_dim + 1].set(b_crit)

    return w_in, w_hh, b_in, w_heads, b_heads, act_dim, hidden, lanes


def actor_critic_rollout(xs, hx0, params):
    """xs: (T, B, obs_dim), hx0: (B, hidden) or None.
    Returns (logits (T,B,act_dim), value (T,B,1), hidden states (T,B,hidden))."""
    T, B, obs_dim = xs.shape
    w_in, w_hh, b_in, w_heads, b_heads, act_dim, hidden, lanes = fold_params(params)
    if hx0 is None:
        hx0 = jnp.zeros((B, hidden), jnp.float32)

    packed = pl.pallas_call(
        actor_critic_step_kernel,
        out_shape=jax.ShapeDtypeStruct((T, B, lanes), jnp.float32),
        grid=(T,),
        in_specs=[
            pl.BlockSpec((1, B, obs_dim), lambda t: (t, 0, 0)),   # x_t streamed per step
            pl.BlockSpec((B, hidden), lambda t: (0, 0)),          # h0 (resident)
            pl.BlockSpec((obs_dim, hidden), lambda t: (0, 0)),    # weights resident across T
            pl.BlockSpec((hidden, hidden), lambda t: (0, 0)),
            pl.BlockSpec((1, hidden), lambda t: (0, 0)),
            pl.BlockSpec((hidden, lanes), lambda t: (0, 0)),
            pl.BlockSpec((1, lanes), lambda t: (0, 0)),
        ],
        out_specs=pl.BlockSpec((1, B, lanes), lambda t: (t, 0, 0)),
        scratch_shapes=[pltpu.VMEM((B, hidden), jnp.float32)],    # hidden-state carry
        compiler_params=pltpu.CompilerParams(
            dimension_semantics=("arbitrary",),  # sequential: state carried across steps
        ),
    )(xs, hx0, w_in, w_hh, b_in, w_heads, b_heads)

    logits = packed[:, :, :act_dim]
    value = packed[:, :, act_dim : act_dim + 1]
    hs = packed[:, :, act_dim + 1 : act_dim + 1 + hidden]
    return logits, value, hs


def actor_critic_forward(x, hx, params):
    """Single step, matching ActorCritic.forward(X, hx): (logits, value, new_hx)."""
    logits, value, hs = actor_critic_rollout(x[None], hx, params)
    return logits[0], value[0], hs[0]


def init_params(key, obs_dim, enc_dim, hidden, act_dim):
    """Deterministic synthetic params. Weights stored as (in, out) = W^T."""
    ks = jax.random.split(key, 10)
    s = 0.1
    return {
        "w_enc": s * jax.random.normal(ks[0], (obs_dim, enc_dim), jnp.float32),
        "b_enc": s * jax.random.normal(ks[1], (1, enc_dim), jnp.float32),
        "w_ih": s * jax.random.normal(ks[2], (enc_dim, hidden), jnp.float32),
        "b_ih": s * jax.random.normal(ks[3], (1, hidden), jnp.float32),
        "w_hh": s * jax.random.normal(ks[4], (hidden, hidden), jnp.float32),
        "b_hh": s * jax.random.normal(ks[5], (1, hidden), jnp.float32),
        "w_act": s * jax.random.normal(ks[6], (hidden, act_dim), jnp.float32),
        "b_act": s * jax.random.normal(ks[7], (1, act_dim), jnp.float32),
        "w_crit": s * jax.random.normal(ks[8], (hidden, 1), jnp.float32),
        "b_crit": s * jax.random.normal(ks[9], (1, 1), jnp.float32),
    }


def reference_step(x, hx, p):
    """Unfused reference, mirrors the PyTorch module graph."""
    enc = x @ p["w_enc"] + p["b_enc"]
    h_new = jnp.tanh(enc @ p["w_ih"] + p["b_ih"] + hx @ p["w_hh"] + p["b_hh"])
    logits = h_new @ p["w_act"] + p["b_act"]
    value = h_new @ p["w_crit"] + p["b_crit"]
    return logits, value, h_new


if __name__ == "__main__":
    B, obs_dim, enc_dim, hidden, act_dim = 8, 16, 32, 32, 4
    T = 6

    key = jax.random.PRNGKey(0)
    k_x, k_xs, k_p = jax.random.split(key, 3)
    params = init_params(k_p, obs_dim, enc_dim, hidden, act_dim)

    # Folding reassociates f32 sums and MXU f32 matmuls may use reduced-precision
    # passes depending on generation/defaults, so compare with a tolerance that
    # covers bf16-pass level error (real bugs produce O(0.1-1) deviations).
    tol = 2e-2

    # --- single step (module semantics: forward(X, hx=None) -> zeros initial state) ---
    x = jax.random.normal(k_x, (B, obs_dim), jnp.float32)
    hx = jnp.zeros((B, hidden), jnp.float32)  # rnn.build_initial_state
    logits, value, new_hx = actor_critic_forward(x, hx, params)
    jax.block_until_ready((logits, value, new_hx))

    ref_logits, ref_value, ref_hx = reference_step(x, hx, params)
    assert logits.shape == (B, act_dim) and value.shape == (B, 1) and new_hx.shape == (B, hidden)
    assert jnp.allclose(logits, ref_logits, atol=tol)
    assert jnp.allclose(value, ref_value, atol=tol)
    assert jnp.allclose(new_hx, ref_hx, atol=tol)

    # --- multi-step rollout: weights stay VMEM-resident, hidden state carried in scratch ---
    xs = jax.random.normal(k_xs, (T, B, obs_dim), jnp.float32)
    l_seq, v_seq, h_seq = actor_critic_rollout(xs, hx, params)
    jax.block_until_ready((l_seq, v_seq, h_seq))

    h = hx
    for t in range(T):
        rl, rv, h = reference_step(xs[t], h, params)
        assert jnp.allclose(l_seq[t], rl, atol=tol)
        assert jnp.allclose(v_seq[t], rv, atol=tol)
        assert jnp.allclose(h_seq[t], h, atol=tol)

    print("KERNEL_OK")
</pallas_src>

<mosaic_0001>
module attributes {stable_mosaic.version = 11 : i64} {
  func.func @actor_critic_step_kernel(%arg0: i32, %arg1: memref<1x8x16xf32, #tpu.memory_space<vmem>>, %arg2: memref<8x32xf32, #tpu.memory_space<vmem>>, %arg3: memref<16x32xf32, #tpu.memory_space<vmem>>, %arg4: memref<32x32xf32, #tpu.memory_space<vmem>>, %arg5: memref<1x32xf32, #tpu.memory_space<vmem>>, %arg6: memref<32x128xf32, #tpu.memory_space<vmem>>, %arg7: memref<1x128xf32, #tpu.memory_space<vmem>>, %arg8: memref<1x8x128xf32, #tpu.memory_space<vmem>>, %arg9: memref<8x32xf32, #tpu.memory_space<vmem>>) attributes {dimension_semantics = [#tpu.dimension_semantics<arbitrary>], iteration_bounds = array<i64: 1>, scalar_prefetch = 0 : i64, scratch_operands = 1 : i64, tpu.core_type = #tpu.core_type<tc>, window_params = [{transform_indices = @transform_0, window_bounds = array<i64: 1, 8, 16>}, {pipeline_mode = #tpu.pipeline_mode<synchronous>, transform_indices = @transform_1, window_bounds = array<i64: 8, 32>}, {pipeline_mode = #tpu.pipeline_mode<synchronous>, transform_indices = @transform_2, window_bounds = array<i64: 16, 32>}, {pipeline_mode = #tpu.pipeline_mode<synchronous>, transform_indices = @transform_3, window_bounds = array<i64: 32, 32>}, {pipeline_mode = #tpu.pipeline_mode<synchronous>, transform_indices = @transform_4, window_bounds = array<i64: 1, 32>}, {pipeline_mode = #tpu.pipeline_mode<synchronous>, transform_indices = @transform_5, window_bounds = array<i64: 32, 128>}, {pipeline_mode = #tpu.pipeline_mode<synchronous>, transform_indices = @transform_6, window_bounds = array<i64: 1, 128>}, {transform_indices = @transform_7, window_bounds = array<i64: 1, 8, 128>}]} {
    %c0_i32 = arith.constant 0 : i32
    %0 = arith.cmpi eq, %arg0, %c0_i32 : i32
    %1 = arith.extui %0 : i1 to i32
    %c0_i32_0 = arith.constant 0 : i32
    %2 = arith.cmpi ne, %1, %c0_i32_0 : i32
    scf.if %2 {
      %c0_22 = arith.constant 0 : index
      %c0_23 = arith.constant 0 : index
      %24 = vector.load %arg2[%c0_22, %c0_23] : memref<8x32xf32, #tpu.memory_space<vmem>>, vector<8x32xf32>
      %c0_24 = arith.constant 0 : index
      %c0_25 = arith.constant 0 : index
      %25 = vector.load %arg9[%c0_24, %c0_25] : memref<8x32xf32, #tpu.memory_space<vmem>>, vector<8x32xf32>
      tpu.vector_store %arg9[%c0_24, %c0_25], %24 {strides = array<i32>} : memref<8x32xf32, #tpu.memory_space<vmem>>, vector<8x32xf32>,
    } else {
    }
    %c0 = arith.constant 0 : index
    %c0_1 = arith.constant 0 : index
    %c0_2 = arith.constant 0 : index
    %3 = vector.load %arg1[%c0, %c0_1, %c0_2] : memref<1x8x16xf32, #tpu.memory_space<vmem>>, vector<1x8x16xf32>
    %4 = vector.shape_cast %3 : vector<1x8x16xf32> to vector<8x16xf32>
    %c0_3 = arith.constant 0 : index
    %c0_4 = arith.constant 0 : index
    %5 = vector.load %arg9[%c0_3, %c0_4] : memref<8x32xf32, #tpu.memory_space<vmem>>, vector<8x32xf32>
    %c0_5 = arith.constant 0 : index
    %c0_6 = arith.constant 0 : index
    %6 = vector.load %arg3[%c0_5, %c0_6] : memref<16x32xf32, #tpu.memory_space<vmem>>, vector<16x32xf32>
    %cst = arith.constant dense<0.000000e+00> : vector<8x32xf32>
    %7 = tpu.matmul %4, %6, %cst {dimension_numbers = #tpu.dot_dimension_numbers<[1], [0], [0], [1], [0, 0, 1, 1], [], []>} : vector<8x16xf32>, vector<16x32xf32>, vector<8x32xf32> -> vector<8x32xf32>
    %c0_7 = arith.constant 0 : index
    %c0_8 = arith.constant 0 : index
    %8 = vector.load %arg4[%c0_7, %c0_8] : memref<32x32xf32, #tpu.memory_space<vmem>>, vector<32x32xf32>
    %cst_9 = arith.constant dense<0.000000e+00> : vector<8x32xf32>
    %9 = tpu.matmul %5, %8, %cst_9 {dimension_numbers = #tpu.dot_dimension_numbers<[1], [0], [0], [1], [0, 0, 1, 1], [], []>} : vector<8x32xf32>, vector<32x32xf32>, vector<8x32xf32> -> vector<8x32xf32>
    %10 = arith.addf %7, %9 : vector<8x32xf32>
    %c0_10 = arith.constant 0 : index
    %c0_11 = arith.constant 0 : index
    %11 = vector.load %arg5[%c0_10, %c0_11] : memref<1x32xf32, #tpu.memory_space<vmem>>, vector<1x32xf32>
    %12 = vector.broadcast %11 : vector<1x32xf32> to vector<8x32xf32>
    %13 = arith.addf %10, %12 : vector<8x32xf32>
    %14 = math.tanh %13 : vector<8x32xf32>
    %c0_12 = arith.constant 0 : index
    %c0_13 = arith.constant 0 : index
    %15 = vector.load %arg9[%c0_12, %c0_13] : memref<8x32xf32, #tpu.memory_space<vmem>>, vector<8x32xf32>
    tpu.vector_store %arg9[%c0_12, %c0_13], %14 {strides = array<i32>} : memref<8x32xf32, #tpu.memory_space<vmem>>, vector<8x32xf32>,
    %c0_14 = arith.constant 0 : index
    %c0_15 = arith.constant 0 : index
    %16 = vector.load %arg6[%c0_14, %c0_15] : memref<32x128xf32, #tpu.memory_space<vmem>>, vector<32x128xf32>
    %cst_16 = arith.constant dense<0.000000e+00> : vector<8x128xf32>
    %17 = tpu.matmul %14, %16, %cst_16 {dimension_numbers = #tpu.dot_dimension_numbers<[1], [0], [0], [1], [0, 0, 1, 1], [], []>} : vector<8x32xf32>, vector<32x128xf32>, vector<8x128xf32> -> vector<8x128xf32>
    %c0_17 = arith.constant 0 : index
    %c0_18 = arith.constant 0 : index
    %18 = vector.load %arg7[%c0_17, %c0_18] : memref<1x128xf32, #tpu.memory_space<vmem>>, vector<1x128xf32>
    %19 = vector.broadcast %18 : vector<1x128xf32> to vector<8x128xf32>
    %20 = arith.addf %17, %19 : vector<8x128xf32>
    %c0_19 = arith.constant 0 : index
    %c0_20 = arith.constant 0 : index
    %c0_21 = arith.constant 0 : index
    %21 = vector.load %arg8[%c0_19, %c0_20, %c0_21] : memref<1x8x128xf32, #tpu.memory_space<vmem>>, vector<1x8x128xf32>
    %22 = vector.shape_cast %21 : vector<1x8x128xf32> to vector<8x128xf32>
    %23 = vector.shape_cast %20 : vector<8x128xf32> to vector<1x8x128xf32>
    tpu.vector_store %arg8[%c0_19, %c0_20, %c0_21], %23 {strides = array<i32>} : memref<1x8x128xf32, #tpu.memory_space<vmem>>, vector<1x8x128xf32>,
    return
  }
  func.func @transform_0(%arg0: i32) -> (i32, i32, i32) {
    %c0_i32 = arith.constant 0 : i32
    %c0_i32_0 = arith.constant 0 : i32
    %c0_i32_1 = arith.constant 0 : i32
    return %arg0, %c0_i32, %c0_i32_0 : i32, i32, i32
  }
  func.func @transform_1(%arg0: i32) -> (i32, i32) {
    %c0_i32 = arith.constant 0 : i32
    %c0_i32_0 = arith.constant 0 : i32
    %c0_i32_1 = arith.constant 0 : i32
    return %c0_i32, %c0_i32_0 : i32, i32
  }
  func.func @transform_2(%arg0: i32) -> (i32, i32) {
    %c0_i32 = arith.constant 0 : i32
    %c0_i32_0 = arith.constant 0 : i32
    %c0_i32_1 = arith.constant 0 : i32
    return %c0_i32, %c0_i32_0 : i32, i32
  }
  func.func @transform_3(%arg0: i32) -> (i32, i32) {
    %c0_i32 = arith.constant 0 : i32
    %c0_i32_0 = arith.constant 0 : i32
    %c0_i32_1 = arith.constant 0 : i32
    return %c0_i32, %c0_i32_0 : i32, i32
  }
  func.func @transform_4(%arg0: i32) -> (i32, i32) {
    %c0_i32 = arith.constant 0 : i32
    %c0_i32_0 = arith.constant 0 : i32
    %c0_i32_1 = arith.constant 0 : i32
    return %c0_i32, %c0_i32_0 : i32, i32
  }
  func.func @transform_5(%arg0: i32) -> (i32, i32) {
    %c0_i32 = arith.constant 0 : i32
    %c0_i32_0 = arith.constant 0 : i32
    %c0_i32_1 = arith.constant 0 : i32
    return %c0_i32, %c0_i32_0 : i32, i32
  }
  func.func @transform_6(%arg0: i32) -> (i32, i32) {
    %c0_i32 = arith.constant 0 : i32
    %c0_i32_0 = arith.constant 0 : i32
    %c0_i32_1 = arith.constant 0 : i32
    return %c0_i32, %c0_i32_0 : i32, i32
  }
  func.func @transform_7(%arg0: i32) -> (i32, i32, i32) {
    %c0_i32 = arith.constant 0 : i32
    %c0_i32_0 = arith.constant 0 : i32
    %c0_i32_1 = arith.constant 0 : i32
    return %arg0, %c0_i32, %c0_i32_0 : i32, i32, i32
  }
}

</mosaic_0001>

<bundles_post_ra>
// kernel: tpu_custom_call.1
= control target key start
LH: loop header
LB: loop body
LE: loop exit
PB: predicated region body
PF: predicated region fallthrough
CT: control target
= control target key end

     0   :  { %12 = vsyncpa [#allocation4], 0  ;;  %s726_s0 = inlined_call_operand.hbm [shape: f32[1,8,16], index: 0, kind: input, shape index: {}]   ;;  %s727_s1 = inlined_call_operand.hbm [shape: f32[8,32], index: 1, kind: input, shape index: {}]   ;;  %s728_s2 = inlined_call_operand.hbm [shape: f32[16,32], index: 2, kind: input, shape index: {}]   ;;  %s729_s3 = inlined_call_operand.hbm [shape: f32[32,32], index: 3, kind: input, shape index: {}]   ;;  %s730_s4 = inlined_call_operand.vmem [shape: f32[1,32], index: 4, kind: input, shape index: {}]   ;;  %s731_s5 = inlined_call_operand.hbm [shape: f32[32,128], index: 5, kind: input, shape index: {}]   ;;  %s732_s6 = inlined_call_operand.vmem [shape: f32[1,128], index: 6, kind: input, shape index: {}]   ;;  %s733_s7 = inlined_call_operand.hbm [shape: f32[1,8,128], index: 7, kind: output, shape index: {}]  }
   0x1   :  { %13 = vsyncpa [#allocation7], 0 }
   0x2   :  { %14 = vsyncpa [#allocation10], 0 }
   0x3   :  { %15 = vsyncpa [#allocation5], 0  ;;  %s581_s24 = smov [#allocation6]   ;;  %s441_s28 = scalar_lea.hbm %s727_s1, 128 }
   0x4   :  { %s32_s25 = sshll.u32 %s581_s24, 4  ;;  %p442_p0 = scmp.ne.s32.totalorder %s727_s1, %s441_s28  ;;  %s33_s25 = int_to_ptr.vmem [resolvable:$true] %s32_s25 }
   0x5   :  { %p445_p1 = scmp.lt.u32.totalorder %s441_s28, %s727_s1 }
   0x7   :  { %p447_p2 = pnand %p445_p1, %p442_p0 }
   0x9   :  { %450 = shalt.err (!%p447_p2)
}
   0xa   :  { %s451_s10 = scalar_lea.vmem %s33_s25, 128  ;;  %p456_p4 = scmp.lt.s32.totalorder %s33_s25, %s33_s25 }
   0xb   :  { %p452_p3 = scmp.ne.s32.totalorder %s33_s25, %s451_s10  ;;  %p457_p5 = scmp.lt.s32.totalorder %s451_s10, %s451_s10 }
   0xd   :  { %p458_p6 = por %p457_p5, %p456_p4 }
   0xf   :  { %p459_p7 = pnand %p458_p6, %p452_p3 }
  0x11   :  { %462 = shalt.err (!%p459_p7)
}
  0x12   :  { %35 = dma.hbm_to_vmem [thread:$0]  %s727_s1, 128, %s33_s25, [#allocation7]  }
  0x13   :  { %s582_s13 = smov [#allocation9]   ;;  %s583_s15 = smov [#allocation3]  }
  0x14   :  { %s53_s14 = sshll.u32 %s582_s13, 4  ;;  %s22_s16 = sshll.u32 %s583_s15, 4  ;;  %s54_s14 = int_to_ptr.vmem [resolvable:$true] %s53_s14  ;;  %s23_s16 = int_to_ptr.vmem [resolvable:$true] %s22_s16 }
  0x15   :  { %s463_s19 = scalar_lea.hbm %s729_s3, 512 }
  0x16   :  { %p464_p8 = scmp.ne.s32.totalorder %s729_s3, %s463_s19  ;;  %p467_p9 = scmp.lt.u32.totalorder %s463_s19, %s729_s3 }
  0x18   :  { %p469_p10 = pnand %p467_p9, %p464_p8 }
  0x1a   :  { %472 = shalt.err (!%p469_p10)
}
  0x1b   :  { %s473_s1 = scalar_lea.vmem %s54_s14, 512  ;;  %p478_p12 = scmp.lt.s32.totalorder %s54_s14, %s54_s14 }
  0x1c   :  { %p474_p11 = scmp.ne.s32.totalorder %s54_s14, %s473_s1  ;;  %p479_p13 = scmp.lt.s32.totalorder %s473_s1, %s473_s1 }
  0x1e   :  { %p480_p0 = por %p479_p13, %p478_p12 }
  0x20   :  { %p481_p1 = pnand %p480_p0, %p474_p11 }
  0x22   :  { %484 = shalt.err (!%p481_p1)
}
  0x23   :  { %s584_s24 = smov 128   ;;  %s585_s25 = smov 8  }
  0x24   :  { %59 = dma.hbm_to_vmem [thread:$0]  %s729_s3, 512, %s54_s14, [#allocation10], %s584_s24, %s584_s24, %s585_s25  }
  0x25   :  { %s485_s30 = scalar_lea.hbm %s726_s0, 128 }
  0x26   :  { %p486_p2 = scmp.ne.s32.totalorder %s726_s0, %s485_s30  ;;  %p489_p3 = scmp.lt.u32.totalorder %s485_s30, %s726_s0 }
  0x28   :  { %p491_p4 = pnand %p489_p3, %p486_p2 }
  0x2a   :  { %494 = shalt.err (!%p491_p4)
}
  0x2b   :  { %s495_s12 = scalar_lea.vmem %s23_s16, 128  ;;  %p500_p6 = scmp.lt.s32.totalorder %s23_s16, %s23_s16 }
  0x2c   :  { %p496_p5 = scmp.ne.s32.totalorder %s23_s16, %s495_s12  ;;  %p501_p7 = scmp.lt.s32.totalorder %s495_s12, %s495_s12 }
  0x2e   :  { %p502_p8 = por %p501_p7, %p500_p6 }
  0x30   :  { %p503_p9 = pnand %p502_p8, %p496_p5 }
  0x32   :  { %506 = shalt.err (!%p503_p9)
}
  0x33   :  { %25 = dma.hbm_to_vmem [thread:$0]  %s726_s0, 128, %s23_s16, [#allocation4]  }
  0x34   :  { %s586_s14 = smov [#allocation8]   ;;  %s587_s17 = smov [#allocation11]  }
  0x35   :  { %s41_s15 = sshll.u32 %s586_s14, 4  ;;  %s67_s18 = sshll.u32 %s587_s17, 4  ;;  %s42_s15 = int_to_ptr.vmem [resolvable:$true] %s41_s15  ;;  %s68_s18 = int_to_ptr.vmem [resolvable:$true] %s67_s18 }
  0x36   :  { %s507_s21 = scalar_lea.hbm %s728_s2, 256 }
  0x37   :  { %p508_p10 = scmp.ne.s32.totalorder %s728_s2, %s507_s21  ;;  %p511_p11 = scmp.lt.u32.totalorder %s507_s21, %s728_s2 }
  0x39   :  { %p513_p12 = pnand %p511_p11, %p508_p10 }
  0x3b   :  { %516 = shalt.err (!%p513_p12)
}
  0x3c   :  { %s517_s0 = scalar_lea.vmem %s42_s15, 256  ;;  %p522_p0 = scmp.lt.s32.totalorder %s42_s15, %s42_s15 }
  0x3d   :  { %p518_p13 = scmp.ne.s32.totalorder %s42_s15, %s517_s0  ;;  %p523_p1 = scmp.lt.s32.totalorder %s517_s0, %s517_s0 }
  0x3f   :  { %p524_p2 = por %p523_p1, %p522_p0 }
  0x41   :  { %p525_p3 = pnand %p524_p2, %p518_p13 }
  0x43   :  { %528 = shalt.err (!%p525_p3)
}
  0x44   :  { %47 = dma.hbm_to_vmem [thread:$0]  %s728_s2, 256, %s42_s15, [#allocation7], %s584_s24, %s584_s24, %s585_s25  }
  0x45   :  { %s529_s30 = scalar_lea.hbm %s731_s5, 512 }
  0x46   :  { %p530_p4 = scmp.ne.s32.totalorder %s731_s5, %s529_s30  ;;  %p533_p5 = scmp.lt.u32.totalorder %s529_s30, %s731_s5 }
  0x48   :  { %p535_p6 = pnand %p533_p5, %p530_p4 }
  0x4a   :  { %538 = shalt.err (!%p535_p6)
}
  0x4b   :  { %s539_s12 = scalar_lea.vmem %s68_s18, 512  ;;  %p544_p8 = scmp.lt.s32.totalorder %s68_s18, %s68_s18 }
  0x4c   :  { %p540_p7 = scmp.ne.s32.totalorder %s68_s18, %s539_s12  ;;  %p545_p9 = scmp.lt.s32.totalorder %s539_s12, %s539_s12 }
  0x4e   :  { %p546_p10 = por %p545_p9, %p544_p8 }
  0x50   :  { %p547_p11 = pnand %p546_p10, %p540_p7 }
  0x52   :  { %550 = shalt.err (!%p547_p11)
}
  0x53   :  { %73 = dma.hbm_to_vmem [thread:$0]  %s731_s5, 512, %s68_s18, [#allocation10], %s584_s24, %s584_s24, %s585_s25  }
  0x54   :  { %573 = dma.done.wait [#allocation4], 128  }
  0x55   :  { %574 = vsyncadd [#allocation4], 4294967168 }
  0x56   :  { %575 = dma.done.wait [#allocation7], 384  }
  0x57   :  { %576 = vsyncadd [#allocation7], 4294966912 }
  0x58   :  { %577 = dma.done.wait [#allocation10], 1024  }
  0x59   :  { %578 = vsyncadd [#allocation10], 4294966272  ;;  %v588_v0 = vmov 0.0|0.0   ;;  %vm589_vm0 = vmmov 0   ;;  %v590_v1 = vmov 0.0   ;;  %v102_v2 = vld [vmem:[#allocation9] sm:$0xff] }
  0x5a   :  { %413 = vmatprep.subr.bf16.mxu0 %v588_v0  ;;  %419 = vmatprep.subr.bf16.mxu1 %v588_v0  ;;  %v103_v3 = vld [vmem:[#allocation9 + $0x8] sm:$0xff]  ;;  %v100_v4 = vld [vmem:[#allocation8] sm:$0xff]  ;;  %vm96_vm1 = vcmask 261120   ;;  %v101_v6 = vld [vmem:[#allocation8 + $0x8] sm:$0xff]  ;;  %vm180_vm2 = vcmask 130048   ;;  %s591_s14 = smov [#allocation12]  }
  0x5b   :  { %399 = vmatprep.mubr.msk.f32.mxu1 %vm589_vm0, %v590_v1  ;;  %392 = vmatprep.mubr.msk.f32.mxu0 %vm589_vm0, %v590_v1  ;;  %v414_v5 = vpack.c.bf16 %v103_v3, %v102_v2  ;;  %v104_v7 = vld [vmem:[#allocation9 + $0x10] sm:$0xff]  ;;  %v105_v8 = vld [vmem:[#allocation9 + $0x18] sm:$0xff]  ;;  %v420_v9 = vpack.c.bf16 %v101_v6, %v100_v4  ;;  %v95_v10 = vld [vmem:[#allocation6] sm:$0xff]  ;;  %s355_s15 = sshll.u32 %s591_s14, 4  ;;  %s356_s15 = int_to_ptr.vmem [resolvable:$true] %s355_s15 }
  0x5c   :  { %v417_v11 = vpack.c.bf16 %v105_v8, %v104_v7  ;;  %97 = vst.msk [vmem:[#allocation2] sm:$0xff] %vm96_vm1, %v95_v10  ;;  %v98_v12 = vld [vmem:[#allocation3] sm:$0xff]  ;;  %v265_v15 = vld [vmem:[#allocation11 + $0x8] sm:$0xff]  ;;  %v266_v17 = vld [vmem:[#allocation11 + $0x10] sm:$0xff]  ;;  %p556_p13 = scmp.lt.s32.totalorder %s356_s15, %s356_s15 }
  0x5d   :  { %415 = vmatpush3.bf16.msra.mxu0 %v414_v5  ;;  %421 = vmatpush3.bf16.msra.mxu1 %v420_v9  ;;  %v264_v14 = vld [vmem:[#allocation11] sm:$0xff]  ;;  %v267_v18 = vld [vmem:[#allocation11 + $0x18] sm:$0xff] }
  0x5e   :  { %416 = vmatprep.subr.bf16.mxu0 %v588_v0  ;;  %422 = vmatprep.subr.bf16.mxu1 %v588_v0  ;;  %v423_v16 = vpack.c.bf16 %v265_v15, %v264_v14  ;;  %v426_v19 = vpack.c.bf16 %v267_v18, %v266_v17  ;;  %v368_v23 = vld [vmem:[%s730_s4] ss:$0 sm:$0xff]  ;;  %s551_s4 = scalar_lea.vmem %s356_s15, 128 }
  0x5f   :  { %v369_v28 = vld [vmem:[%s732_s6] ss:$0 sm:$0xff]  ;;  %p552_p12 = scmp.ne.s32.totalorder %s356_s15, %s551_s4  ;;  %p557_p0 = scmp.lt.s32.totalorder %s551_s4, %s551_s4 }
  0x60   :  { %400 = vmatmul.mubr.msk.f32.vlgmr.msra.gmra.mrb[0].mxu1 %vm180_vm2, %v98_v12 }
  0x61   :  { %418 = vmatpush3.bf16.msra.mxu0 %v417_v11  ;;  %410 = vmatprep.mubr.msk.f32.mxu1 %vm589_vm0, %v590_v1  ;;  %p558_p1 = por %p557_p0, %p556_p13 }
  0x62   :  { %424 = vmatpush3.bf16.msra.mxu1 %v423_v16 }
  0x63   :  { %v99_v13 = vld [vmem:[#allocation2] sm:$0xff]  ;;  %425 = vmatprep.subr.bf16.mxu1 %v588_v0  ;;  %p559_p2 = pnand %p558_p1, %p552_p12 }
  0x64   :  { %393 = vmatmul.mubr.msk.f32.vlgmr.msra.gmra.mrb[0].mxu0 %vm96_vm1, %v99_v13 }
  0x66   :  { %427 = vmatpush3.bf16.msra.mxu1 %v426_v19 }
 0x133   :  { %v250_v20 = vpop.f32.mrb[0].mxu1 }
 0x134   :  { %v401_v21 = vpop.f32.mrb[1].mxu1 }
 0x137   :  { %v176_v22 = vpop.f32.mrb[0].mxu0 }
 0x138   :  { %v251_v24 = vadd.f32 %v250_v20, %v176_v22  ;;  %v394_v25 = vpop.f32.mrb[1].mxu0 }
 0x13a   :  { %v261_v26 = vadd.f32 %v368_v23, %v251_v24 }
 0x13c   :  { %439 = vtanh.f32 %v261_v26 }
 0x146   :  { %v440_v27 = vpop.eup %439 }
 0x147   :  { %263 = vst.msk [vmem:[#allocation2] sm:$0xff] %vm96_vm1, %v440_v27  ;;  %411 = vmatmul.mubr.msk.f32.vlgmr.msra.gmra.mrb[2].mxu1 %vm96_vm1, %v440_v27 }
 0x21a   :  { %v344_v29 = vpop.f32.mrb[2].mxu1 }
 0x21b   :  { %v345_v30 = vadd.f32 %v369_v28, %v344_v29  ;;  %v412_v31 = vpop.f32.mrb[3].mxu1 }
 0x21d   :  { %348 = vst [vmem:[#allocation12] sm:$0xff] %v345_v30 }
 0x21e   :  { %562 = shalt.err (!%p559_p2)
}
 0x21f   :  { %s563_s19 = scalar_lea.hbm %s733_s7, 128 }
 0x220   :  { %p564_p3 = scmp.ne.s32.totalorder %s733_s7, %s563_s19  ;;  %p567_p4 = scmp.lt.u32.totalorder %s563_s19, %s733_s7 }
 0x222   :  { %p569_p5 = pnand %p567_p4, %p564_p3 }
 0x224   :  { %572 = shalt.err (!%p569_p5)
}
 0x225   :  { %358 = dma.vmem_to_hbm [thread:$0]  %s356_s15, 128, %s733_s7, [#allocation5]  }
 0x226   :  { %579 = dma.done.wait [#allocation5], 128  }
 0x227   :  { %580 = vsyncadd [#allocation5], 4294967168 }
 0x228   :  { %362 = vsyncpa [#allocation4], 1 }
 0x229   :  { %363 = vsyncpa [#allocation7], 1 }
 0x22a   :  { %364 = vsyncpa [#allocation10], 1 }
 0x22b   :  { %365 = vsyncpa [#allocation5], 1 }

</bundles_post_ra>
